<compile_context>
chip_gen: v7x
topology: tpu7x:2x2x1
jax: 0.10.0
libtpu: 0.0.40
codegen_flags: <defaults>
</compile_context>

<pallas_src>
import functools

import jax
import jax.numpy as jnp
from jax import lax
from jax.experimental import pallas as pl
from jax.experimental.pallas import tpu as pltpu


def _round_up(x: int, m: int) -> int:
    return ((x + m - 1) // m) * m


def _conv3x3_kernel(x_ref, w_ref, shift_ref, mask_ref, o_ref, col_ref, *,
                    cin: int, kpad: int, shifts, act: bool):
    """One grid step = NB images.

    x_ref:     (NB, Cin, P)   flat NCHW input block (lane axis = H*W)
    w_ref:     (Cout, Kpad)   BN-folded conv weights, K ordered (dy, dx, ci), zero-padded
    shift_ref: (Cout, 1)      folded conv-bias + BN shift (f32)
    mask_ref:  (9, 1, P)      0/1 tap-validity masks (implements padding=1)
    o_ref:     (NB, Cout, P)
    col_ref:   (NB, Kpad, P)  VMEM im2col scratch
    """
    nb = x_ref.shape[0]
    p = x_ref.shape[2]
    kreal = 9 * cin
    pad = kpad - kreal

    if pad:
        # Zero the K-padding rows once so the zero weight columns never meet NaN/Inf garbage.
        @pl.when(pl.program_id(0) == 0)
        def _():
            col_ref[:, kreal:, :] = jnp.zeros((nb, pad, p), col_ref.dtype)

    # ---- im2col build: 9 rolls + 8 mask-multiplies over the WHOLE batch block -------
    # (hoisted: 9 XLU rolls / VPU multiplies total per grid step, not 9 * NB)
    x = x_ref[...]                           # (NB, Cin, P)
    masks = mask_ref[...]                    # (9, 1, P)
    for t, s in enumerate(shifts):           # 9 static taps, order (dy, dx)
        if s == 0:
            rolled = x
        else:
            # result[..., q] = x[..., q + s]; out-of-image lanes are zeroed by the mask.
            rolled = pltpu.roll(x, shift=(-s) % p, axis=2)
        if t == 4:                           # center tap: mask is all ones -> skip it
            tap = rolled
        else:
            tap = rolled * masks[t]          # (1, P) broadcast over (NB, Cin, P)
        col_ref[:, t * cin:(t + 1) * cin, :] = tap

    # ---- per-image matmul + f32 epilogue (MXU side is tiny: M = Cout) ---------------
    w = w_ref[...]                                        # (Cout, Kpad)
    shift = shift_ref[...].astype(jnp.float32)            # (Cout, 1)

    @pl.loop(0, nb)
    def _(b):
        acc = jnp.dot(w, col_ref[b], preferred_element_type=jnp.float32)   # (Cout, P)
        acc = acc + shift                                  # conv bias + BN affine
        if act:
            acc = acc * jax.nn.sigmoid(acc)                # SiLU (EUP)
        o_ref[b] = acc.astype(o_ref.dtype)


def _pick_vmem_limit_bytes() -> int:
    """~half the physical per-core VMEM, capped at 64 MiB.

    v5e/v6e: 128 MiB/core -> 64 MiB limit (big blocks); v7x: 64 MiB/core -> 32 MiB limit.
    """
    cap = 0
    try:
        cap = int(pltpu.get_tpu_info().vmem_capacity_bytes)
    except Exception:
        cap = 0
    if cap <= 0:
        cap = 64 * 1024 * 1024          # conservative fallback = v7x per-core VMEM
    return max(16 * 1024 * 1024, min(cap // 2, 64 * 1024 * 1024))


def conv3x3_forward(x_nchw, w_oihw, bias, gamma, beta, running_mean, running_var,
                    *, act: bool = False, eps: float = 1e-5,
                    compute_dtype=None, out_dtype=None):
    """Matches Conv3x3.forward with BatchNorm2d in eval mode (running statistics).

    compute_dtype: operand dtype inside the kernel.  Pass jnp.bfloat16 on v6e/v7x for
        ~2x MXU rate and half the HBM/VMEM traffic (epilogue stays f32); defaults to
        x's dtype to preserve the PyTorch f32 numerics (test tolerance 2e-4).
    out_dtype: dtype of the written output (bf16 cuts the dominant HBM stream ~2x).
    """
    N, Cin, H, W = x_nchw.shape
    Cout = w_oihw.shape[0]
    P = H * W
    compute_dtype = jnp.dtype(compute_dtype) if compute_dtype is not None else jnp.dtype(x_nchw.dtype)
    out_dtype = jnp.dtype(out_dtype) if out_dtype is not None else jnp.dtype(x_nchw.dtype)
    csz = compute_dtype.itemsize
    osz = out_dtype.itemsize

    kreal = 9 * Cin
    kpad = _round_up(kreal, 8)            # 8-aligned MXU contraction dim

    # ---- fold conv bias + BatchNorm into the weights (plain JAX glue, done once) ----
    scale = gamma / jnp.sqrt(running_var + eps)                        # (Cout,)
    w_folded = w_oihw * scale[:, None, None, None]
    w2 = jnp.transpose(w_folded, (0, 2, 3, 1)).reshape(Cout, kreal)    # K order (dy, dx, ci)
    if kpad != kreal:
        w2 = jnp.pad(w2, ((0, 0), (0, kpad - kreal)))
    w2 = w2.astype(compute_dtype)
    shift = (bias * scale + beta - running_mean * scale).reshape(Cout, 1).astype(jnp.float32)

    # ---- tap shifts + validity masks (padding=1 handled in-kernel, no jnp.pad of x) --
    pos = jnp.arange(P, dtype=jnp.int32)
    hh, ww = pos // W, pos % W
    shifts, masks = [], []
    for dy in range(3):
        for dx in range(3):
            shifts.append((dy - 1) * W + (dx - 1))
            masks.append((hh >= 1 - dy) & (hh <= H - dy) & (ww >= 1 - dx) & (ww <= W - dx))
    mask_arr = jnp.stack(masks).astype(compute_dtype).reshape(9, 1, P)

    # ---- batch blocking against the per-generation VMEM budget -----------------------
    vmem_limit = _pick_vmem_limit_bytes()
    budget = vmem_limit // 2
    per_img = (2 * Cin * P * csz          # input block (double-buffered)
               + 2 * Cout * P * osz       # output block (double-buffered)
               + kpad * P * csz           # im2col scratch
               + 2 * Cin * P * csz)       # roll/mask temporaries headroom
    NB = max(1, min(N, budget // max(per_img, 1)))
    if N >= 2:
        NB = min(NB, pl.cdiv(N, 2))       # >= 2 grid steps so both v7x TensorCores get work
    grid = (pl.cdiv(N, NB),)
    n_pad = grid[0] * NB

    x_flat = x_nchw.reshape(N, Cin, P).astype(compute_dtype)
    if n_pad != N:                        # ragged batch: pad instead of collapsing NB to 1
        x_flat = jnp.pad(x_flat, ((0, n_pad - N), (0, 0), (0, 0)))
    # TODO(synk): if H*W were ever not a multiple of 128, also pad the flat lane dim so
    #             output stores stay lane-dense (not needed for these shapes).

    kernel = functools.partial(_conv3x3_kernel, cin=Cin, kpad=kpad,
                               shifts=tuple(shifts), act=act)
    flops = 2 * N * P * kreal * Cout + 4 * N * Cout * P
    bytes_accessed = (x_flat.size * csz + w2.size * csz + mask_arr.size * csz
                      + shift.size * 4 + n_pad * Cout * P * osz)

    out_flat = pl.pallas_call(
        kernel,
        out_shape=jax.ShapeDtypeStruct((n_pad, Cout, P), out_dtype),
        grid_spec=pltpu.PrefetchScalarGridSpec(
            num_scalar_prefetch=0,
            grid=grid,
            in_specs=[
                pl.BlockSpec((NB, Cin, P), lambda g: (g, 0, 0)),
                pl.BlockSpec((Cout, kpad), lambda g: (0, 0)),
                pl.BlockSpec((Cout, 1), lambda g: (0, 0)),
                pl.BlockSpec((9, 1, P), lambda g: (0, 0, 0)),
            ],
            out_specs=pl.BlockSpec((NB, Cout, P), lambda g: (g, 0, 0)),
            scratch_shapes=[pltpu.VMEM((NB, kpad, P), compute_dtype)],
        ),
        compiler_params=pltpu.CompilerParams(
            dimension_semantics=("parallel",),
            vmem_limit_bytes=vmem_limit,
        ),
        cost_estimate=pl.CostEstimate(
            flops=flops,
            transcendentals=(N * Cout * P) if act else 0,
            bytes_accessed=bytes_accessed,
        ),
    )(x_flat, w2, shift, mask_arr)

    return out_flat[:N].reshape(N, Cout, H, W)


def _reference(x_nchw, w_oihw, bias, gamma, beta, running_mean, running_var,
               *, act: bool, eps: float = 1e-5):
    y = lax.conv_general_dilated(
        x_nchw, w_oihw, window_strides=(1, 1), padding=((1, 1), (1, 1)),
        dimension_numbers=("NCHW", "OIHW", "NCHW"))
    y = y + bias[None, :, None, None]
    scale = gamma / jnp.sqrt(running_var + eps)
    shift = beta - running_mean * scale
    y = y * scale[None, :, None, None] + shift[None, :, None, None]
    if act:
        y = y * jax.nn.sigmoid(y)
    return y


if __name__ == "__main__":
    # Small shapes consistent with the module: batch=2, ch_input=4, ch_output=8, 16x16 spatial.
    N, Cin, Cout, H, W = 2, 4, 8, 16, 16
    act = True

    key = jax.random.PRNGKey(0)
    kx, kw, kb = jax.random.split(key, 3)
    x = jax.random.normal(kx, (N, Cin, H, W), dtype=jnp.float32)
    w = jax.random.normal(kw, (Cout, Cin, 3, 3), dtype=jnp.float32) * 0.1
    b = jax.random.normal(kb, (Cout,), dtype=jnp.float32) * 0.1

    # BatchNorm2d parameters at their deterministic defaults.
    # TODO(synk): BatchNorm is implemented in inference mode (running stats);
    #             training-mode batch statistics are not computed in the kernel.
    gamma = jnp.ones((Cout,), jnp.float32)
    beta = jnp.zeros((Cout,), jnp.float32)
    running_mean = jnp.zeros((Cout,), jnp.float32)
    running_var = jnp.ones((Cout,), jnp.float32)

    out = conv3x3_forward(x, w, b, gamma, beta, running_mean, running_var, act=act)
    out = jax.block_until_ready(out)

    ref = _reference(x, w, b, gamma, beta, running_mean, running_var, act=act)
    assert out.shape == (N, Cout, H, W)
    assert jnp.allclose(out, ref, atol=2e-4, rtol=2e-4), float(jnp.max(jnp.abs(out - ref)))
    print("KERNEL_OK")
</pallas_src>

<mosaic_0001>
module attributes {stable_mosaic.version = 11 : i64} {
  func.func @_conv3x3_kernel(%arg0: i32, %arg1: memref<1x4x256xf32, #tpu.memory_space<vmem>>, %arg2: memref<8x40xf32, #tpu.memory_space<vmem>>, %arg3: memref<8x1xf32, #tpu.memory_space<vmem>>, %arg4: memref<9x1x256xf32, #tpu.memory_space<vmem>>, %arg5: memref<1x8x256xf32, #tpu.memory_space<vmem>>, %arg6: memref<1x40x256xf32, #tpu.memory_space<vmem>>) attributes {dimension_semantics = [#tpu.dimension_semantics<parallel>], iteration_bounds = array<i64: 2>, scalar_prefetch = 0 : i64, scratch_operands = 1 : i64, tpu.core_type = #tpu.core_type<tc>, window_params = [{transform_indices = @transform_0, window_bounds = array<i64: 1, 4, 256>}, {pipeline_mode = #tpu.pipeline_mode<synchronous>, transform_indices = @transform_1, window_bounds = array<i64: 8, 40>}, {pipeline_mode = #tpu.pipeline_mode<synchronous>, transform_indices = @transform_2, window_bounds = array<i64: 8, 1>}, {pipeline_mode = #tpu.pipeline_mode<synchronous>, transform_indices = @transform_3, window_bounds = array<i64: 9, 1, 256>}, {transform_indices = @transform_4, window_bounds = array<i64: 1, 8, 256>}]} {
    %c0_i32 = arith.constant 0 : i32
    %0 = arith.cmpi eq, %arg0, %c0_i32 : i32
    %1 = arith.extui %0 : i1 to i32
    %c0_i32_0 = arith.constant 0 : i32
    %2 = arith.cmpi ne, %1, %c0_i32_0 : i32
    scf.if %2 {
      %cst_38 = arith.constant 0.000000e+00 : f32
      %82 = vector.broadcast %cst_38 : f32 to vector<1x4x256xf32>
      %c0_39 = arith.constant 0 : index
      %c36 = arith.constant 36 : index
      %c0_40 = arith.constant 0 : index
      %83 = vector.load %arg6[%c0_39, %c36, %c0_40] : memref<1x40x256xf32, #tpu.memory_space<vmem>>, vector<1x4x256xf32>
      tpu.vector_store %arg6[%c0_39, %c36, %c0_40], %82 {strides = array<i32>} : memref<1x40x256xf32, #tpu.memory_space<vmem>>, vector<1x4x256xf32>,
    } else {
    }
    %c0 = arith.constant 0 : index
    %c0_1 = arith.constant 0 : index
    %c0_2 = arith.constant 0 : index
    %3 = vector.load %arg1[%c0, %c0_1, %c0_2] : memref<1x4x256xf32, #tpu.memory_space<vmem>>, vector<1x4x256xf32>
    %c0_3 = arith.constant 0 : index
    %c0_4 = arith.constant 0 : index
    %c0_5 = arith.constant 0 : index
    %4 = vector.load %arg4[%c0_3, %c0_4, %c0_5] : memref<9x1x256xf32, #tpu.memory_space<vmem>>, vector<9x1x256xf32>
    %c17_i32 = arith.constant 17 : i32
    %5 = tpu.dynamic_rotate %3 by %c17_i32 dim 2 : vector<1x4x256xf32>, i32 -> vector<1x4x256xf32>
    %6 = vector.extract_strided_slice %4 {offsets = [0, 0, 0], sizes = [1, 1, 256], strides = [1, 1, 1]} : vector<9x1x256xf32> to vector<1x1x256xf32>
    %7 = vector.shape_cast %6 : vector<1x1x256xf32> to vector<1x256xf32>
    %8 = vector.shape_cast %7 : vector<1x256xf32> to vector<1x1x256xf32>
    %9 = vector.broadcast %8 : vector<1x1x256xf32> to vector<1x4x256xf32>
    %10 = arith.mulf %5, %9 : vector<1x4x256xf32>
    %c0_6 = arith.constant 0 : index
    %c0_7 = arith.constant 0 : index
    %c0_8 = arith.constant 0 : index
    %11 = vector.load %arg6[%c0_6, %c0_7, %c0_8] : memref<1x40x256xf32, #tpu.memory_space<vmem>>, vector<1x4x256xf32>
    tpu.vector_store %arg6[%c0_6, %c0_7, %c0_8], %10 {strides = array<i32>} : memref<1x40x256xf32, #tpu.memory_space<vmem>>, vector<1x4x256xf32>,
    %c16_i32 = arith.constant 16 : i32
    %12 = tpu.dynamic_rotate %3 by %c16_i32 dim 2 : vector<1x4x256xf32>, i32 -> vector<1x4x256xf32>
    %13 = vector.extract_strided_slice %4 {offsets = [1, 0, 0], sizes = [1, 1, 256], strides = [1, 1, 1]} : vector<9x1x256xf32> to vector<1x1x256xf32>
    %14 = vector.shape_cast %13 : vector<1x1x256xf32> to vector<1x256xf32>
    %15 = vector.shape_cast %14 : vector<1x256xf32> to vector<1x1x256xf32>
    %16 = vector.broadcast %15 : vector<1x1x256xf32> to vector<1x4x256xf32>
    %17 = arith.mulf %12, %16 : vector<1x4x256xf32>
    %c0_9 = arith.constant 0 : index
    %c4 = arith.constant 4 : index
    %c0_10 = arith.constant 0 : index
    %18 = vector.load %arg6[%c0_9, %c4, %c0_10] : memref<1x40x256xf32, #tpu.memory_space<vmem>>, vector<1x4x256xf32>
    tpu.vector_store %arg6[%c0_9, %c4, %c0_10], %17 {strides = array<i32>} : memref<1x40x256xf32, #tpu.memory_space<vmem>>, vector<1x4x256xf32>,
    %c15_i32 = arith.constant 15 : i32
    %19 = tpu.dynamic_rotate %3 by %c15_i32 dim 2 : vector<1x4x256xf32>, i32 -> vector<1x4x256xf32>
    %20 = vector.extract_strided_slice %4 {offsets = [2, 0, 0], sizes = [1, 1, 256], strides = [1, 1, 1]} : vector<9x1x256xf32> to vector<1x1x256xf32>
    %21 = vector.shape_cast %20 : vector<1x1x256xf32> to vector<1x256xf32>
    %22 = vector.shape_cast %21 : vector<1x256xf32> to vector<1x1x256xf32>
    %23 = vector.broadcast %22 : vector<1x1x256xf32> to vector<1x4x256xf32>
    %24 = arith.mulf %19, %23 : vector<1x4x256xf32>
    %c0_11 = arith.constant 0 : index
    %c8 = arith.constant 8 : index
    %c0_12 = arith.constant 0 : index
    %25 = vector.load %arg6[%c0_11, %c8, %c0_12] : memref<1x40x256xf32, #tpu.memory_space<vmem>>, vector<1x4x256xf32>
    tpu.vector_store %arg6[%c0_11, %c8, %c0_12], %24 {strides = array<i32>} : memref<1x40x256xf32, #tpu.memory_space<vmem>>, vector<1x4x256xf32>,
    %c1_i32 = arith.constant 1 : i32
    %26 = tpu.dynamic_rotate %3 by %c1_i32 dim 2 : vector<1x4x256xf32>, i32 -> vector<1x4x256xf32>
    %27 = vector.extract_strided_slice %4 {offsets = [3, 0, 0], sizes = [1, 1, 256], strides = [1, 1, 1]} : vector<9x1x256xf32> to vector<1x1x256xf32>
    %28 = vector.shape_cast %27 : vector<1x1x256xf32> to vector<1x256xf32>
    %29 = vector.shape_cast %28 : vector<1x256xf32> to vector<1x1x256xf32>
    %30 = vector.broadcast %29 : vector<1x1x256xf32> to vector<1x4x256xf32>
    %31 = arith.mulf %26, %30 : vector<1x4x256xf32>
    %c0_13 = arith.constant 0 : index
    %c12 = arith.constant 12 : index
    %c0_14 = arith.constant 0 : index
    %32 = vector.load %arg6[%c0_13, %c12, %c0_14] : memref<1x40x256xf32, #tpu.memory_space<vmem>>, vector<1x4x256xf32>
    tpu.vector_store %arg6[%c0_13, %c12, %c0_14], %31 {strides = array<i32>} : memref<1x40x256xf32, #tpu.memory_space<vmem>>, vector<1x4x256xf32>,
    %c0_15 = arith.constant 0 : index
    %c16 = arith.constant 16 : index
    %c0_16 = arith.constant 0 : index
    %33 = vector.load %arg6[%c0_15, %c16, %c0_16] : memref<1x40x256xf32, #tpu.memory_space<vmem>>, vector<1x4x256xf32>
    tpu.vector_store %arg6[%c0_15, %c16, %c0_16], %3 {strides = array<i32>} : memref<1x40x256xf32, #tpu.memory_space<vmem>>, vector<1x4x256xf32>,
    %c255_i32 = arith.constant 255 : i32
    %34 = tpu.dynamic_rotate %3 by %c255_i32 dim 2 : vector<1x4x256xf32>, i32 -> vector<1x4x256xf32>
    %35 = vector.extract_strided_slice %4 {offsets = [5, 0, 0], sizes = [1, 1, 256], strides = [1, 1, 1]} : vector<9x1x256xf32> to vector<1x1x256xf32>
    %36 = vector.shape_cast %35 : vector<1x1x256xf32> to vector<1x256xf32>
    %37 = vector.shape_cast %36 : vector<1x256xf32> to vector<1x1x256xf32>
    %38 = vector.broadcast %37 : vector<1x1x256xf32> to vector<1x4x256xf32>
    %39 = arith.mulf %34, %38 : vector<1x4x256xf32>
    %c0_17 = arith.constant 0 : index
    %c20 = arith.constant 20 : index
    %c0_18 = arith.constant 0 : index
    %40 = vector.load %arg6[%c0_17, %c20, %c0_18] : memref<1x40x256xf32, #tpu.memory_space<vmem>>, vector<1x4x256xf32>
    tpu.vector_store %arg6[%c0_17, %c20, %c0_18], %39 {strides = array<i32>} : memref<1x40x256xf32, #tpu.memory_space<vmem>>, vector<1x4x256xf32>,
    %c241_i32 = arith.constant 241 : i32
    %41 = tpu.dynamic_rotate %3 by %c241_i32 dim 2 : vector<1x4x256xf32>, i32 -> vector<1x4x256xf32>
    %42 = vector.extract_strided_slice %4 {offsets = [6, 0, 0], sizes = [1, 1, 256], strides = [1, 1, 1]} : vector<9x1x256xf32> to vector<1x1x256xf32>
    %43 = vector.shape_cast %42 : vector<1x1x256xf32> to vector<1x256xf32>
    %44 = vector.shape_cast %43 : vector<1x256xf32> to vector<1x1x256xf32>
    %45 = vector.broadcast %44 : vector<1x1x256xf32> to vector<1x4x256xf32>
    %46 = arith.mulf %41, %45 : vector<1x4x256xf32>
    %c0_19 = arith.constant 0 : index
    %c24 = arith.constant 24 : index
    %c0_20 = arith.constant 0 : index
    %47 = vector.load %arg6[%c0_19, %c24, %c0_20] : memref<1x40x256xf32, #tpu.memory_space<vmem>>, vector<1x4x256xf32>
    tpu.vector_store %arg6[%c0_19, %c24, %c0_20], %46 {strides = array<i32>} : memref<1x40x256xf32, #tpu.memory_space<vmem>>, vector<1x4x256xf32>,
    %c240_i32 = arith.constant 240 : i32
    %48 = tpu.dynamic_rotate %3 by %c240_i32 dim 2 : vector<1x4x256xf32>, i32 -> vector<1x4x256xf32>
    %49 = vector.extract_strided_slice %4 {offsets = [7, 0, 0], sizes = [1, 1, 256], strides = [1, 1, 1]} : vector<9x1x256xf32> to vector<1x1x256xf32>
    %50 = vector.shape_cast %49 : vector<1x1x256xf32> to vector<1x256xf32>
    %51 = vector.shape_cast %50 : vector<1x256xf32> to vector<1x1x256xf32>
    %52 = vector.broadcast %51 : vector<1x1x256xf32> to vector<1x4x256xf32>
    %53 = arith.mulf %48, %52 : vector<1x4x256xf32>
    %c0_21 = arith.constant 0 : index
    %c28 = arith.constant 28 : index
    %c0_22 = arith.constant 0 : index
    %54 = vector.load %arg6[%c0_21, %c28, %c0_22] : memref<1x40x256xf32, #tpu.memory_space<vmem>>, vector<1x4x256xf32>
    tpu.vector_store %arg6[%c0_21, %c28, %c0_22], %53 {strides = array<i32>} : memref<1x40x256xf32, #tpu.memory_space<vmem>>, vector<1x4x256xf32>,
    %c239_i32 = arith.constant 239 : i32
    %55 = tpu.dynamic_rotate %3 by %c239_i32 dim 2 : vector<1x4x256xf32>, i32 -> vector<1x4x256xf32>
    %56 = vector.extract_strided_slice %4 {offsets = [8, 0, 0], sizes = [1, 1, 256], strides = [1, 1, 1]} : vector<9x1x256xf32> to vector<1x1x256xf32>
    %57 = vector.shape_cast %56 : vector<1x1x256xf32> to vector<1x256xf32>
    %58 = vector.shape_cast %57 : vector<1x256xf32> to vector<1x1x256xf32>
    %59 = vector.broadcast %58 : vector<1x1x256xf32> to vector<1x4x256xf32>
    %60 = arith.mulf %55, %59 : vector<1x4x256xf32>
    %c0_23 = arith.constant 0 : index
    %c32 = arith.constant 32 : index
    %c0_24 = arith.constant 0 : index
    %61 = vector.load %arg6[%c0_23, %c32, %c0_24] : memref<1x40x256xf32, #tpu.memory_space<vmem>>, vector<1x4x256xf32>
    tpu.vector_store %arg6[%c0_23, %c32, %c0_24], %60 {strides = array<i32>} : memref<1x40x256xf32, #tpu.memory_space<vmem>>, vector<1x4x256xf32>,
    %c0_25 = arith.constant 0 : index
    %c0_26 = arith.constant 0 : index
    %62 = vector.load %arg2[%c0_25, %c0_26] : memref<8x40xf32, #tpu.memory_space<vmem>>, vector<8x40xf32>
    %c0_27 = arith.constant 0 : index
    %c0_28 = arith.constant 0 : index
    %63 = vector.load %arg3[%c0_27, %c0_28] : memref<8x1xf32, #tpu.memory_space<vmem>>, vector<8x1xf32>
    %c0_i32_29 = arith.constant 0 : i32
    %c1_i32_30 = arith.constant 1 : i32
    %64 = arith.muli %c0_i32_29, %c1_i32_30 : i32
    %c0_i32_31 = arith.constant 0 : i32
    %65 = arith.addi %c0_i32_31, %64 : i32
    %66 = arith.index_cast %65 : i32 to index
    %c0_32 = arith.constant 0 : index
    %c0_33 = arith.constant 0 : index
    %67 = vector.load %arg6[%66, %c0_32, %c0_33] : memref<1x40x256xf32, #tpu.memory_space<vmem>>, vector<1x40x256xf32>
    %68 = vector.shape_cast %67 : vector<1x40x256xf32> to vector<40x256xf32>
    %cst = arith.constant dense<0.000000e+00> : vector<8x256xf32>
    %69 = tpu.matmul %62, %68, %cst {dimension_numbers = #tpu.dot_dimension_numbers<[1], [0], [0], [1], [0, 0, 1, 1], [], []>} : vector<8x40xf32>, vector<40x256xf32>, vector<8x256xf32> -> vector<8x256xf32>
    %70 = vector.broadcast %63 : vector<8x1xf32> to vector<8x256xf32>
    %71 = arith.addf %69, %70 : vector<8x256xf32>
    %72 = arith.negf %71 : vector<8x256xf32>
    %73 = math.exp %72 : vector<8x256xf32>
    %cst_34 = arith.constant 1.000000e+00 : f32
    %74 = vector.broadcast %cst_34 : f32 to vector<8x256xf32>
    %75 = arith.addf %74, %73 : vector<8x256xf32>
    %76 = arith.divf %74, %75 : vector<8x256xf32>
    %77 = arith.mulf %71, %76 : vector<8x256xf32>
    %78 = arith.index_cast %65 : i32 to index
    %c0_35 = arith.constant 0 : index
    %c0_36 = arith.constant 0 : index
    %79 = vector.load %arg5[%78, %c0_35, %c0_36] : memref<1x8x256xf32, #tpu.memory_space<vmem>>, vector<1x8x256xf32>
    %80 = vector.shape_cast %79 : vector<1x8x256xf32> to vector<8x256xf32>
    %81 = vector.shape_cast %77 : vector<8x256xf32> to vector<1x8x256xf32>
    tpu.vector_store %arg5[%78, %c0_35, %c0_36], %81 {strides = array<i32>} : memref<1x8x256xf32, #tpu.memory_space<vmem>>, vector<1x8x256xf32>,
    %c1_i32_37 = arith.constant 1 : i32
    return
  }
  func.func @transform_0(%arg0: i32) -> (i32, i32, i32) {
    %c0_i32 = arith.constant 0 : i32
    %c0_i32_0 = arith.constant 0 : i32
    %c0_i32_1 = arith.constant 0 : i32
    return %arg0, %c0_i32, %c0_i32_0 : i32, i32, i32
  }
  func.func @transform_1(%arg0: i32) -> (i32, i32) {
    %c0_i32 = arith.constant 0 : i32
    %c0_i32_0 = arith.constant 0 : i32
    %c0_i32_1 = arith.constant 0 : i32
    return %c0_i32, %c0_i32_0 : i32, i32
  }
  func.func @transform_2(%arg0: i32) -> (i32, i32) {
    %c0_i32 = arith.constant 0 : i32
    %c0_i32_0 = arith.constant 0 : i32
    %c0_i32_1 = arith.constant 0 : i32
    return %c0_i32, %c0_i32_0 : i32, i32
  }
  func.func @transform_3(%arg0: i32) -> (i32, i32, i32) {
    %c0_i32 = arith.constant 0 : i32
    %c0_i32_0 = arith.constant 0 : i32
    %c0_i32_1 = arith.constant 0 : i32
    %c0_i32_2 = arith.constant 0 : i32
    return %c0_i32, %c0_i32_0, %c0_i32_1 : i32, i32, i32
  }
  func.func @transform_4(%arg0: i32) -> (i32, i32, i32) {
    %c0_i32 = arith.constant 0 : i32
    %c0_i32_0 = arith.constant 0 : i32
    %c0_i32_1 = arith.constant 0 : i32
    return %arg0, %c0_i32, %c0_i32_0 : i32, i32, i32
  }
}

</mosaic_0001>

<bundles_post_ra>
// kernel: tpu_custom_call.1
= control target key start
LH: loop header
LB: loop body
LE: loop exit
PB: predicated region body
PF: predicated region fallthrough
CT: control target
= control target key end

     0   :  { %9 = vsyncpa [#allocation4], 0  ;;  %s1204_s0 = inlined_call_operand.hbm [shape: f32[2,4,256], index: 0, kind: input, shape index: {}]   ;;  %s1205_s1 = inlined_call_operand.hbm [shape: f32[8,40], index: 1, kind: input, shape index: {}]   ;;  %s1206_s2 = inlined_call_operand.vmem [shape: f32[8,1], index: 2, kind: input, shape index: {}]   ;;  %s1207_s3 = inlined_call_operand.vmem [shape: f32[9,1,256], index: 3, kind: input, shape index: {}]   ;;  %s1208_s4 = inlined_call_operand.hbm [shape: f32[2,8,256], index: 4, kind: output, shape index: {}]  }
   0x1   :  { %11 = vsyncpa [#allocation4 + $0x1], 0 }
   0x2   :  { %12 = vsyncpa [#allocation7], 0 }
   0x3   :  { %13 = vsyncpa [#allocation5], 0 }
   0x4   :  { %15 = vsyncpa [#allocation5 + $0x1], 0  ;;  %s929_s15 = smov 0   ;;  %s931_s16 = smov 0  }
   0x5   :  { %s933_s17 = smov 0   ;;  %s935_s18 = smov 0  }
   0x6 LB: > { %s950_s19 = sadd.s32 4294967295, %s888_s18   ;;  %s652_s20 = sadd.s32 4294967294, %s888_s18   ;;  %s888_s18 = sphi %s935_s18, %s1233_s18   ;;  %s884_s17 = sphi %s933_s17, %s1232_s17   ;;  %s880_s16 = sphi %s931_s16, %s1231_s16   ;;  %s876_s15 = sphi %s929_s15, %s1230_s15  }
   0x7   : > { %p41_p0 = scmp.ne.s32.totalorder %s880_s16, %s876_s15  ;;  %p1209_p1 = scmp.eq.s32.totalorder %s950_s19, 0 }
   0x8   : > { %p134_p3 = scmp.eq.s32.totalorder %s652_s20, 1  ;;  %p653_p5 = scmp.ge.s32.totalorder %s888_s18, 1 }
   0x9   : > { %p959_p4 = por %p1209_p1, %p41_p0  ;;  %p141_p7 = scmp.lt.s32.totalorder %s888_s18, 3 }
   0xa   : > { %p964_p6 = por %p134_p3, %p41_p0  ;;  %s890_s24 = smov [#allocation6]  }
   0xb   : > { %s1212_s21 = scalar_select %p959_p4, 1, 0 }
   0xc   : > { %s1213_s22 = scalar_select %p964_p6, 1, 0 }
   0xd   : > { %p970_p9 = pnand %p653_p5, %p141_p7  ;;  %s154_s25 = sshll.u32 %s890_s24, 4  ;;  %s155_s25 = int_to_ptr.vmem [resolvable:$true] %s154_s25 }
   0xe   : > { %s978_s26 = sadd.s32 1, %s888_s18   ;;  %s28_s30 = sadd.s32 1, %s884_s17 }
   0xf   : > { %s1214_s23 = scalar_select %p970_p9, 1, 0 }
  0x10   : > { %p690_p11 = pneg %p970_p9  ;;  %s25_s28 = ssub.s32 %s888_s18, %s978_s26 }
  0x11   : > { %p988_p13 = scmp.eq.s32.totalorder %s25_s28, 0  ;;  %s760_s7 = scalar_lea.hbm %s1205_s1, 128 }
  0x12   : > { %p982_p12 = pnand %p690_p11, %p1209_p1  ;;  %p761_p3 = scmp.ne.s32.totalorder %s1205_s1, %s760_s7 }
  0x13   : > { %s1216_s29 = scalar_select %p988_p13, 1, 0 }
  0x14   : > { %p762_p5 = pneg %p982_p12  ;;  %p767_p10 = scmp.lt.u32.totalorder %s760_s7, %s1205_s1 }
  0x16   : > { %p763_p7 = pnand %p762_p5, %p761_p3 }
  0x18   : > { %p764_p11 = pneg %p763_p7 }
  0x1a   : > { %p769_p8 = pnand %p767_p10, %p764_p11 }
  0x1c   : > { %772 = shalt.err (!%p769_p8)
}
  0x1d   : > { %s773_s12 = scalar_lea.vmem %s155_s25, 128  ;;  %p781_p6 = scmp.lt.s32.totalorder %s155_s25, %s155_s25 }
  0x1e   : > { %p774_p1 = scmp.ne.s32.totalorder %s155_s25, %s773_s12  ;;  %p782_p4 = scmp.lt.s32.totalorder %s773_s12, %s773_s12 }
  0x20   : > { %p776_p2 = pnand %p774_p1, %p762_p5  ;;  %p783_p9 = por %p782_p4, %p781_p6 }
  0x22   : > { %p777_p0 = pneg %p776_p2 }
  0x24   : > { %p784_p13 = pnand %p783_p9, %p777_p0 }
  0x26   : > { %787 = shalt.err (!%p784_p13)
}
  0x27   : > { %693 = dma.hbm_to_vmem [thread:$0]  (!%p982_p12), %s1205_s1, 128, %s155_s25, [#allocation7]  }
  0x28   : > { %p1217_p1 = scmp.ne.s32.totalorder %s1216_s29, 0  ;;  %p36_p2 = scmp.eq.s32.totalorder %s888_s18, 0 }
  0x29   : > { %p1218_p4 = scmp.ne.s32.totalorder %s884_s17, %s880_s16  ;;  %p1219_p6 = scmp.eq.s32.totalorder %s950_s19, 1 }
  0x2a   : > { %s1014_s20 = scalar_select %p1217_p1, %s884_s17, %s28_s30  }
  0x2b   : > { %p1022_p8 = por %p1219_p6, %p1218_p4  ;;  %p703_p9 = scmp.lt.s32.totalorder %s888_s18, 2 }
  0x2c   : > { %s171_s27 = sand.u32 1, %s884_s17   ;;  %p1221_p10 = pmov %p1218_p4 }
  0x2d   : > { %s656_s28 = sshll.u32 %s171_s27, 3  ;;  %s672_s5 = sshll.u32 %s888_s18, 7 }
  0x2e   : > { %p37_p13 = por %p36_p2, %p1221_p10  ;;  %s1035_s25 = scalar_lea.hbm %s1204_s0, %s672_s5 }
  0x2f   : > { %s175_s29 = scalar_lea.vmem [#allocation3], %s656_s28  ;;  %s172_s9 = scalar_lea.sflag [#allocation4], %s171_s27 }
  0x30   : > { %s183_s30 = sshll.u32 %s175_s29, 4  ;;  %p1037_p12 = pnand %p703_p9, %p37_p13  ;;  %s1041_s30 = int_to_ptr.vmem [resolvable:$true] %s183_s30 }
  0x31   : > { %s788_s10 = scalar_lea.hbm %s1035_s25, 128  ;;  %s793_s13 = scalar_lea.hbm %s1204_s0, 256 }
  0x32   : > { %p789_p0 = scmp.ne.s32.totalorder %s1035_s25, %s788_s10  ;;  %p790_p3 = pneg %p1037_p12 }
  0x33   : > { %p794_p11 = scmp.lt.u32.totalorder %s1035_s25, %s1204_s0  ;;  %p795_p1 = scmp.lt.u32.totalorder %s793_s13, %s788_s10 }
  0x34   : > { %p791_p5 = pnand %p790_p3, %p789_p0  ;;  %p797_p4 = scmp.lt.u32.totalorder %s788_s10, %s1035_s25 }
  0x35   : > { %p796_p2 = por %p795_p1, %p794_p11 }
  0x36   : > { %p792_p7 = pneg %p791_p5 }
  0x37   : > { %p798_p6 = por %p797_p4, %p796_p2 }
  0x39   : > { %p799_p9 = pnand %p798_p6, %p792_p7 }
  0x3b   : > { %802 = shalt.err (!%p799_p9)
}
  0x3c   : > { %s803_s27 = scalar_lea.vmem %s1041_s30, 128  ;;  %s891_s5 = smov [#allocation3]  }
  0x3d   : > { %p804_p10 = scmp.ne.s32.totalorder %s1041_s30, %s803_s27  ;;  %s808_s6 = sshll.u32 %s891_s5, 4  ;;  %s809_s6 = int_to_ptr.vmem [resolvable:$false] %s808_s6 }
  0x3e   : > { %s810_s7 = scalar_lea.vmem %s809_s6, 256  ;;  %p811_p5 = scmp.lt.s32.totalorder %s1041_s30, %s809_s6 }
  0x3f   : > { %p806_p13 = pnand %p804_p10, %p790_p3  ;;  %p812_p11 = scmp.lt.s32.totalorder %s810_s7, %s803_s27 }
  0x41   : > { %p807_p0 = pneg %p806_p13  ;;  %p813_p1 = por %p812_p11, %p811_p5 }
  0x43   : > { %p814_p2 = pnand %p813_p1, %p807_p0 }
  0x45   : > { %817 = shalt.err (!%p814_p2)
}
  0x46   : > { %697 = dma.hbm_to_vmem [thread:$0]  (!%p1037_p12), %s1035_s25, 128, %s1041_s30, %s172_s9  }
  0x47   : > { %p1223_p7 = scmp.ne.s32.totalorder %s1214_s23, 0 }
  0x48   : > { %s1071_s29 = sand.u32 (!%p1223_p7), 1, %s880_s16   ;;  %p1224_p3 = scmp.ne.s32.totalorder (!%p1223_p7), %s1212_s21, 0 }
  0x49   : > { %192 = sbr.rel (%p1223_p7) target bundleno = 509 (0x1fd), region = 36  ;;  %s660_s10 = sshll.u32 (!%p1223_p7), %s1071_s29, 3 }
  0x4a   : > { %s195_s11 = scalar_lea.sflag (!%p1223_p7), [#allocation4], %s1071_s29  ;;  %s198_s12 = scalar_lea.vmem (!%p1223_p7), [#allocation3], %s660_s10 }
  0x50   : > { %863 = dma.done.wait (%p1224_p3), %s195_s11, 128  }
  0x51   : > { %865 = vsyncadd (%p1224_p3), %s195_s11, 4294967168  ;;  %p1225_p4 = scmp.eq.s32.totalorder %s950_s19, 0 }
  0x53   : > { %867 = dma.done.wait (%p1225_p4), [#allocation7], 128   ;;  %p1226_p12 = pmov %p1225_p4 }
  0x54   : > { %s662_s23 = sshll.u32 %s1071_s29, 4  ;;  %p1227_p6 = scmp.ne.s32.totalorder %s950_s19, 0 }
  0x55   : > { %869 = vsyncadd (%p1226_p12), [#allocation7], 4294967168  ;;  %s1084_s25 = scalar_lea.vmem [#allocation8], %s662_s23  ;;  %v892_v0 = vmov (!%p1227_p6), 0.0  }
  0x56   : > { %230 = sbr.rel (%p1227_p6) target bundleno = 93 (0x5d), region = 48  ;;  %231 = vst [vmem:[#allocation2 + $0x40] sm:$0xf0] (!%p1227_p6), %v892_v0  ;;  %232 = vst [vmem:[#allocation2 + $0x48] sm:$0xf0] (!%p1227_p6), %v892_v0 }
  0x5d PF: > { %v233_v1 = vld [vmem:[%s198_s12] sm:$0xff]  ;;  %s893_s21 = smov 1   ;;  %s894_s30 = smov 16   ;;  %v901_v3 = vmov 0.0   ;;  %v450_v4 = vld [vmem:[%s1206_s2] sm:$0xff]  ;;  %v902_v5 = vmov 0   ;;  %v249_v6 = vlaneseq }
  0x5e   : > { %319 = vrot.lane.b32.xlu1 %v233_v1, %s893_s21  ;;  %347 = vst [vmem:[#allocation2 + $0x20] sm:$0xf] %v233_v1  ;;  %269 = vrot.lane.b32.xlu0 %v233_v1, %s894_s30  ;;  %v243_v2 = vcombine.high %v233_v1, %v233_v1  ;;  %s895_s8 = smov 17   ;;  %s896_s9 = smov 15   ;;  %v237_v11 = vld [vmem:[%s1207_s3 + $0x6] sm:$0x3] }
  0x5f   : > { %s897_s13 = smov 127   ;;  %s898_s14 = smov 112   ;;  %534 = vmatprep.mubr.f32.mxu0 %v901_v3  ;;  %750 = vset.pattern.permute.xlu0 %v902_v5  ;;  %v256_v7 = vshrl.u32 %v249_v6, 7  ;;  %v1091_v8 = vand.u32 127, %v249_v6  ;;  %v235_v12 = vld [vmem:[%s1207_s3 + $0x2] sm:$0x3] }
  0x60   : > { %348 = vst [vmem:[#allocation2 + $0x28] sm:$0xf] %v243_v2  ;;  %s899_s28 = smov 113   ;;  %s900_s27 = smov 111   ;;  %v234_v15 = vld [vmem:[%s1207_s3] sm:$0x3] }
  0x61   : > { %v1093_v9 = vsub.s32 0, %v256_v7  ;;  %v1095_v10 = vsub.s32 1, %v256_v7  ;;  %vm323_vm0 = vcmp.lt.s32.totalorder %v1091_v8, 1  ;;  %vm273_vm1 = vcmp.lt.s32.totalorder %v1091_v8, 16  ;;  %v236_v32 = vld [vmem:[%s1207_s3 + $0x4] sm:$0x3] }
  0x62   : > { %321 = vrot.lane.b32.xlu1 %v243_v2, %s893_s21  ;;  %271 = vrot.lane.b32.xlu0 %v243_v2, %s894_s30  ;;  %vm251_vm2 = vcmp.lt.s32.totalorder %v1091_v8, 17  ;;  %vm301_vm3 = vcmp.lt.s32.totalorder %v1091_v8, 15  ;;  %v238_v45 = vld [vmem:[%s1207_s3 + $0xa] sm:$0x3]  ;;  %vm353_vm4 = vcmp.lt.s32.totalorder %v1091_v8, 127  ;;  %vm403_vm5 = vcmp.lt.s32.totalorder %v1091_v8, 112 }
  0x63   : > { %v330_v16 = vrot.slane %v237_v11, %v1093_v9  ;;  %v334_v17 = vrot.slane %v237_v11, %v1095_v10  ;;  %v280_v18 = vrot.slane %v235_v12, %v1093_v9  ;;  %v284_v19 = vrot.slane %v235_v12, %v1095_v10  ;;  %v240_v54 = vld [vmem:[%s1207_s3 + $0xe] sm:$0x3]  ;;  %v239_v63 = vld [vmem:[%s1207_s3 + $0xc] sm:$0x3]  ;;  %s673_s10 = sshll.u32 %s950_s19, 8  ;;  %s572_s11 = sshll.u32 %s1084_s25, 4  ;;  %s1160_s11 = int_to_ptr.vmem [resolvable:$true] %s572_s11 }
  0x64   : > { %v258_v22 = vrot.slane %v234_v15, %v1093_v9  ;;  %v262_v23 = vrot.slane %v234_v15, %v1095_v10  ;;  %v308_v43 = vrot.slane %v236_v32, %v1093_v9  ;;  %v312_v44 = vrot.slane %v236_v32, %v1095_v10  ;;  %s1158_s21 = scalar_lea.hbm %s1208_s4, %s673_s10  ;;  %s558_s30 = scalar_lea.sflag [#allocation5], %s1071_s29 }
  0x65   : > { %v360_v52 = vrot.slane %v238_v45, %v1093_v9  ;;  %v364_v53 = vrot.slane %v238_v45, %v1095_v10  ;;  %v410_v61 = vrot.slane %v240_v54, %v1093_v9  ;;  %v414_v62 = vrot.slane %v240_v54, %v1095_v10  ;;  %s903_s19 = smov [#allocation8]  }
  0x66   : > { %247 = vrot.lane.b32.xlu1 %v243_v2, %s895_s8  ;;  %245 = vrot.lane.b32.xlu0 %v233_v1, %s895_s8  ;;  %vm381_vm6 = vcmp.lt.s32.totalorder %v1091_v8, 113  ;;  %v388_v11 = vrot.slane %v239_v63, %v1093_v9  ;;  %v392_v12 = vrot.slane %v239_v63, %v1095_v10  ;;  %vm431_vm7 = vcmp.lt.s32.totalorder %v1091_v8, 111  ;;  %s818_s8 = scalar_lea.vmem %s1160_s11, 256 }
  0x67   : > { %vm466_vm8 = vcmask 326656   ;;  %p819_p9 = scmp.ne.s32.totalorder %s1160_s11, %s818_s8 }
  0x69   : > { %p820_p10 = pnand %p819_p9, %p1022_p8 }
  0x6a   : > { %299 = vrot.lane.b32.xlu1 %v243_v2, %s896_s9  ;;  %297 = vrot.lane.b32.xlu0 %v233_v1, %s896_s9  ;;  %s822_s9 = sshll.u32 %s903_s19, 4  ;;  %s823_s9 = int_to_ptr.vmem [resolvable:$false] %s822_s9 }
  0x6b   : > { %p821_p13 = pneg %p820_p10  ;;  %p825_p0 = scmp.lt.s32.totalorder %s1160_s11, %s823_s9 }
  0x6e   : > { %351 = vrot.lane.b32.xlu1 %v243_v2, %s897_s13  ;;  %349 = vrot.lane.b32.xlu0 %v233_v1, %s897_s13  ;;  %s824_s13 = scalar_lea.vmem %s823_s9, 512 }
  0x6f   : > { %p826_p5 = scmp.lt.s32.totalorder %s824_s13, %s818_s8 }
  0x71   : > { %p827_p11 = por %p826_p5, %p825_p0 }
  0x72   : > { %401 = vrot.lane.b32.xlu1 %v243_v2, %s898_s14  ;;  %399 = vrot.lane.b32.xlu0 %v233_v1, %s898_s14 }
  0x73   : > { %p828_p1 = pnand %p827_p11, %p821_p13 }
  0x76   : > { %379 = vrot.lane.b32.xlu1 %v243_v2, %s899_s28  ;;  %377 = vrot.lane.b32.xlu0 %v233_v1, %s899_s28 }
  0x7a   : > { %429 = vrot.lane.b32.xlu1 %v243_v2, %s900_s27  ;;  %427 = vrot.lane.b32.xlu0 %v233_v1, %s900_s27 }
  0x7e   : > { %463 = vperm.xlu0 %750, %v450_v4  }
  0xd0   : > { %v320_v13 = vpop.permute.xlu1 %319  ;;  %v270_v14 = vpop.permute.xlu0 %269 }
  0xd4   : > { %v322_v20 = vpop.permute.xlu1 %321  ;;  %v272_v21 = vpop.permute.xlu0 %271 }
  0xd5   : > { %v324_v24 = vsel %vm323_vm0, %v320_v13, %v322_v20  ;;  %v325_v25 = vsel %vm323_vm0, %v322_v20, %v320_v13  ;;  %v274_v26 = vsel %vm273_vm1, %v270_v14, %v272_v21  ;;  %v275_v27 = vsel %vm273_vm1, %v272_v21, %v270_v14  ;;  %v241_v14 = vld [vmem:[%s1207_s3 + $0x10] sm:$0x3] }
  0xd6   : > { %v337_v28 = vmul.f32 %v330_v16, %v325_v25  ;;  %v338_v29 = vmul.f32 %v334_v17, %v324_v24  ;;  %v287_v30 = vmul.f32 %v280_v18, %v275_v27  ;;  %v288_v31 = vmul.f32 %v284_v19, %v274_v26 }
  0xd8   : > { %v341_v33 = vrot.slane %v337_v28, 4  ;;  %v342_v34 = vrot.slane %v338_v29, 4  ;;  %v291_v35 = vrot.slane %v287_v30, 4  ;;  %v292_v36 = vrot.slane %v288_v31, 4  ;;  %v248_v37 = vpop.permute.xlu1 %247  ;;  %v246_v38 = vpop.permute.xlu0 %245 }
  0xd9   : > { %v252_v39 = vsel %vm251_vm2, %v246_v38, %v248_v37  ;;  %v253_v40 = vsel %vm251_vm2, %v248_v37, %v246_v38  ;;  %v438_v28 = vrot.slane %v241_v14, %v1093_v9  ;;  %v442_v29 = vrot.slane %v241_v14, %v1095_v10 }
  0xda   : > { %345 = vst [vmem:[#allocation2 + $0x10] sm:$0xf0] %v341_v33  ;;  %346 = vst [vmem:[#allocation2 + $0x18] sm:$0xf0] %v342_v34  ;;  %v265_v41 = vmul.f32 %v258_v22, %v253_v40  ;;  %v266_v42 = vmul.f32 %v262_v23, %v252_v39 }
  0xdb   : > { %295 = vst [vmem:[#allocation2] sm:$0xf0] %v291_v35  ;;  %296 = vst [vmem:[#allocation2 + $0x8] sm:$0xf0] %v292_v36 }
  0xdc   : > { %267 = vst [vmem:[#allocation2] sm:$0xf] %v265_v41  ;;  %268 = vst [vmem:[#allocation2 + $0x8] sm:$0xf] %v266_v42  ;;  %v300_v46 = vpop.permute.xlu1 %299  ;;  %v298_v47 = vpop.permute.xlu0 %297  ;;  %v449_v41 = vld [vmem:[#allocation6] sm:$0xff] }
  0xdd   : > { %v302_v48 = vsel %vm301_vm3, %v298_v47, %v300_v46  ;;  %v303_v49 = vsel %vm301_vm3, %v300_v46, %v298_v47 }
  0xde   : > { %v315_v50 = vmul.f32 %v308_v43, %v303_v49  ;;  %v316_v51 = vmul.f32 %v312_v44, %v302_v48 }
  0xe0   : > { %317 = vst [vmem:[#allocation2 + $0x10] sm:$0xf] %v315_v50  ;;  %318 = vst [vmem:[#allocation2 + $0x18] sm:$0xf] %v316_v51  ;;  %v352_v55 = vpop.permute.xlu1 %351  ;;  %v350_v56 = vpop.permute.xlu0 %349 }
  0xe1   : > { %v354_v57 = vsel %vm353_vm4, %v350_v56, %v352_v55  ;;  %v355_v58 = vsel %vm353_vm4, %v352_v55, %v350_v56 }
  0xe2   : > { %v367_v59 = vmul.f32 %v360_v52, %v354_v57  ;;  %v368_v60 = vmul.f32 %v364_v53, %v355_v58 }
  0xe3   : > { %v452_v13 = vld [vmem:[#allocation2 + $0x8] sm:$0xff]  ;;  %v451_v16 = vld [vmem:[#allocation2] sm:$0xff] }
  0xe4   : > { %v371_v0 = vrot.slane %v367_v59, 4  ;;  %v372_v1 = vrot.slane %v368_v60, 4  ;;  %v402_v2 = vpop.permute.xlu1 %401  ;;  %v400_v3 = vpop.permute.xlu0 %399 }
  0xe5   : > { %v404_v4 = vsel %vm403_vm5, %v400_v3, %v402_v2  ;;  %v405_v5 = vsel %vm403_vm5, %v402_v2, %v400_v3 }
  0xe6   : > { %375 = vst [vmem:[#allocation2 + $0x20] sm:$0xf0] %v371_v0  ;;  %376 = vst [vmem:[#allocation2 + $0x28] sm:$0xf0] %v372_v1  ;;  %v417_v6 = vmul.f32 %v410_v61, %v404_v4  ;;  %v418_v7 = vmul.f32 %v414_v62, %v405_v5 }
  0xe7   : > { %v454_v15 = vld [vmem:[#allocation2 + $0x18] sm:$0xff]  ;;  %v453_v17 = vld [vmem:[#allocation2 + $0x10] sm:$0xff] }
  0xe8   : > { %v421_v18 = vrot.slane %v417_v6, 4  ;;  %v422_v19 = vrot.slane %v418_v7, 4  ;;  %v380_v20 = vpop.permute.xlu1 %379  ;;  %v378_v21 = vpop.permute.xlu0 %377  ;;  %v674_v22 = vpack.c.bf16 %v454_v15, %v452_v13  ;;  %v676_v23 = vpack.c.bf16 %v453_v17, %v451_v16 }
  0xe9   : > { %v382_v24 = vsel %vm381_vm6, %v378_v21, %v380_v20  ;;  %v383_v25 = vsel %vm381_vm6, %v380_v20, %v378_v21 }
  0xea   : > { %425 = vst [vmem:[#allocation2 + $0x30] sm:$0xf0] %v421_v18  ;;  %426 = vst [vmem:[#allocation2 + $0x38] sm:$0xf0] %v422_v19  ;;  %v395_v26 = vmul.f32 %v388_v11, %v382_v24  ;;  %v396_v27 = vmul.f32 %v392_v12, %v383_v25  ;;  %675 = vmatprep.subr.bf16.mxu0 %v674_v22 }
  0xeb   : > { %677 = vmatpush1.bf16.msra.mxu0 %v676_v23 }
  0xec   : > { %397 = vst [vmem:[#allocation2 + $0x30] sm:$0xf] %v395_v26  ;;  %398 = vst [vmem:[#allocation2 + $0x38] sm:$0xf] %v396_v27  ;;  %v430_v30 = vpop.permute.xlu1 %429  ;;  %v428_v31 = vpop.permute.xlu0 %427 }
  0xed   : > { %v432_v32 = vsel %vm431_vm7, %v428_v31, %v430_v30  ;;  %v433_v33 = vsel %vm431_vm7, %v430_v30, %v428_v31  ;;  %v456_v8 = vld [vmem:[#allocation2 + $0x28] sm:$0xff]  ;;  %v455_v37 = vld [vmem:[#allocation2 + $0x20] sm:$0xff] }
  0xee   : > { %v445_v34 = vmul.f32 %v438_v28, %v432_v32  ;;  %v446_v35 = vmul.f32 %v442_v29, %v433_v33 }
  0xf0   : > { %447 = vst [vmem:[#allocation2 + $0x40] sm:$0xf] %v445_v34  ;;  %448 = vst [vmem:[#allocation2 + $0x48] sm:$0xf] %v446_v35 }
  0xf3   : > { %v458_v36 = vld [vmem:[#allocation2 + $0x38] sm:$0xff]  ;;  %v457_v38 = vld [vmem:[#allocation2 + $0x30] sm:$0xff] }
  0xf4   : > { %v678_v39 = vpack.c.bf16 %v458_v36, %v456_v8  ;;  %v680_v40 = vpack.c.bf16 %v457_v38, %v455_v37 }
  0xf6   : > { %679 = vmatprep.subr.bf16.mxu0 %v678_v39 }
  0xf7   : > { %681 = vmatpush1.bf16.msra.mxu0 %v680_v40  ;;  %v460_v9 = vld [vmem:[#allocation2 + $0x48] sm:$0xff]  ;;  %v459_v10 = vld [vmem:[#allocation2 + $0x40] sm:$0xff] }
  0xf8   : > { %478 = vmatprep.subr.mxu0 %v460_v9 }
  0xfb   : > { %479 = vmatpush1.msra.mxu0 %v459_v10 }
  0xfc   : > { %664 = vmatmul.mubr.msk.f32.vlgmr.msra.gmra.mrb[0].mxu0 %vm466_vm8, %v449_v41 }
  0xfd   : > { %v464_v42 = vpop.permute.xlu0 %463 }
 0x1cf   : > { %v536_v43 = vpop.f32.mrb[0].mxu0 }
 0x1d0   : > { %v537_v44 = vadd.f32 %v536_v43, %v464_v42  ;;  %v538_v45 = vpop.f32.mrb[1].mxu0 }
 0x1d1   : > { %v539_v46 = vadd.f32 %v538_v45, %v464_v42 }
 0x1d2   : > { %v665_v47 = vmul.f32 -1.442695, %v537_v44 }
 0x1d3   : > { %v666_v48 = vmul.f32 -1.442695, %v539_v46 }
 0x1d4   : > { %752 = vpow2.f32 %v665_v47 }
 0x1d5   : > { %754 = vpow2.f32 %v666_v48 }
 0x1de   : > { %v753_v49 = vpop.eup %752 }
 0x1df   : > { %v755_v50 = vpop.eup %754  ;;  %v547_v51 = vadd.f32 1.0, %v753_v49 }
 0x1e0   : > { %v548_v52 = vadd.f32 1.0, %v755_v50 }
 0x1e1   : > { %756 = vrcp.f32 %v547_v51 }
 0x1e2   : > { %758 = vrcp.f32 %v548_v52 }
 0x1eb   : > { %v757_v53 = vpop.eup %756 }
 0x1ec   : > { %v759_v54 = vpop.eup %758  ;;  %v553_v55 = vmul.f32 %v757_v53, %v537_v44 }
 0x1ed   : > { %v554_v56 = vmul.f32 %v759_v54, %v539_v46 }
 0x1ee   : > { %555 = vst [vmem:[%s1084_s25] sm:$0xff] %v553_v55 }
 0x1ef   : > { %556 = vst [vmem:[%s1084_s25 + $0x8] sm:$0xff] %v554_v56 }
 0x1f0   : > { %831 = shalt.err (!%p828_p1)
}
 0x1f1   : > { %s832_s29 = scalar_lea.hbm %s1158_s21, 256  ;;  %s836_s28 = scalar_lea.hbm %s1208_s4, 512 }
 0x1f2   : > { %p833_p2 = scmp.ne.s32.totalorder %s1158_s21, %s832_s29  ;;  %p837_p4 = scmp.lt.u32.totalorder %s1158_s21, %s1208_s4 }
 0x1f3   : > { %p838_p12 = scmp.lt.u32.totalorder %s836_s28, %s832_s29  ;;  %p840_p9 = scmp.lt.u32.totalorder %s832_s29, %s1158_s21 }
 0x1f4   : > { %p834_p7 = pnand %p833_p2, %p1022_p8 }
 0x1f5   : > { %p839_p6 = por %p838_p12, %p837_p4 }
 0x1f6   : > { %p835_p3 = pneg %p834_p7 }
 0x1f7   : > { %p841_p10 = por %p840_p9, %p839_p6 }
 0x1f9   : > { %p842_p13 = pnand %p841_p10, %p835_p3 }
 0x1fb   : > { %845 = shalt.err (!%p842_p13)
}
 0x1fc   : > { %688 = dma.vmem_to_hbm [thread:$0]  (%p1022_p8), %s1160_s11, 256, %s1158_s21, %s558_s30  }
 0x1fd PF: > { %s584_s6 = sand.u32 1, %s876_s15   ;;  %p1228_p0 = scmp.ne.s32.totalorder %s1213_s22, 0 }
 0x1fe   : > { %p1229_p5 = scmp.ge.s32.totalorder %s888_s18, 2  ;;  %s585_s7 = scalar_lea.sflag [#allocation5], %s584_s6 }
 0x200   : > { %p699_p11 = pnand %p1229_p5, %p1228_p0 }
 0x202   : > { %871 = dma.done.wait (!%p699_p11), %s585_s7, 256  }
 0x203   : > { %873 = vsyncadd (!%p699_p11), %s585_s7, 4294967040  ;;  %p18_p1 = scmp.ge.s32.totalorder %s978_s26, 4   ;;  %s1230_s15 = smov %s880_s16 }
 0x204   : > { %s1231_s16 = smov %s884_s17  ;;  %s1232_s17 = smov %s1014_s20 }
 0x205   : > { %s1233_s18 = smov %s978_s26  ;;  %20 = sbr.rel (!%p18_p1) target bundleno = 6 (0x6), region = 89 }
 0x20c   :  { %590 = vsyncpa [#allocation4], 1 }
 0x20d   :  { %592 = vsyncpa [#allocation4 + $0x1], 1 }
 0x20e   :  { %593 = vsyncpa [#allocation7], 1 }
 0x20f   :  { %594 = vsyncpa [#allocation5], 1 }
 0x210   :  { %596 = vsyncpa [#allocation5 + $0x1], 1 }

</bundles_post_ra>
